<compile_context>
chip_gen: v6e
topology: v6e:2x2x1
jax: 0.10.0
libtpu: 0.0.40
codegen_flags: <defaults>
</compile_context>

<pallas_src>
import functools

import jax
import jax.numpy as jnp
from jax import lax
from jax.experimental import pallas as pl
from jax.experimental.pallas import tpu as pltpu

LANE = 128


def _round_up(x, m):
    return ((x + m - 1) // m) * m


def _actor_categorical_kernel(x_ref, w1_ref, b1_ref, w2_ref, b2_ref, g_ref,
                              logp_ref, act_ref, *, n_actions):
    # ---- actor_net MLP: Linear -> ReLU -> Linear (bf16 operands, f32 acc) ----
    h = jnp.dot(x_ref[...], w1_ref[...],
                preferred_element_type=jnp.float32) + b1_ref[...]
    h = jnp.maximum(h, 0.0)
    logits = jnp.dot(h.astype(jnp.bfloat16), w2_ref[...],
                     preferred_element_type=jnp.float32) + b2_ref[...]

    # mask padded action lanes so they never affect the normalizer or sample
    lane = lax.broadcasted_iota(jnp.int32, logits.shape, 1)
    valid = lane < n_actions
    neg = jnp.float32(-1e30)
    logits = jnp.where(valid, logits, neg)

    # ---- Categorical(logits=...) -> normalized log-probs (pi.logits) ----
    m = jnp.max(logits, axis=-1, keepdims=True)
    lse = m + jnp.log(jnp.sum(jnp.exp(logits - m), axis=-1, keepdims=True))
    logp = logits - lse
    logp_ref[...] = logp                      # lane-dense (TB, 128k) f32 slab

    # ---- pi.sample() via the Gumbel-max trick (noise streamed per tile) ----
    z = jnp.where(valid, logp + g_ref[...], neg)
    zmax = jnp.max(z, axis=-1, keepdims=True)
    big = jnp.iinfo(jnp.int32).max
    act = jnp.min(jnp.where(z >= zmax, lane, big), axis=-1, keepdims=True)
    # lane-dense int32 slab (action broadcast across 128 lanes); caller slices
    # column 0.  Width is fixed at LANE regardless of the padded action width.
    act_ref[...] = jnp.broadcast_to(act, act_ref.shape)


@jax.jit
def actor_categorical_forward(states, w1, b1, w2, b2, rng_key):
    """Pallas forward of ActorCategorical.

    Returns (pi_log_probs [B, A] f32  -- Categorical(logits).logits,
             actions      [B]    int32 -- pi.sample() via Gumbel-max)."""
    B, OBS = states.shape
    HID, ACT = w2.shape[0], w2.shape[1]

    # lane-dense padding of every feature axis to a multiple of 128
    F_IN = _round_up(OBS, LANE)
    F_HID = _round_up(HID, LANE)
    F_ACT = _round_up(ACT, LANE)

    # batch tile: multiple of 8 sublanes; big tiles amortize per-step overhead
    TB = min(512, _round_up(B, 8))
    B_pad = _round_up(B, TB)

    xp = jnp.zeros((B_pad, F_IN), jnp.bfloat16).at[:B, :OBS].set(
        states.astype(jnp.bfloat16))
    w1p = jnp.zeros((F_IN, F_HID), jnp.bfloat16).at[:OBS, :HID].set(
        w1.astype(jnp.bfloat16))
    b1p = jnp.zeros((1, F_HID), jnp.float32).at[:, :HID].set(
        b1.reshape(1, HID).astype(jnp.float32))
    w2p = jnp.zeros((F_HID, F_ACT), jnp.bfloat16).at[:HID, :ACT].set(
        w2.astype(jnp.bfloat16))
    b2p = jnp.zeros((1, F_ACT), jnp.float32).at[:, :ACT].set(
        b2.reshape(1, ACT).astype(jnp.float32))
    gumbel = jax.random.gumbel(rng_key, (B_pad, F_ACT), jnp.float32)

    kernel = functools.partial(_actor_categorical_kernel, n_actions=ACT)

    logp, act = pl.pallas_call(
        kernel,
        out_shape=(jax.ShapeDtypeStruct((B_pad, F_ACT), jnp.float32),
                   jax.ShapeDtypeStruct((B_pad, LANE), jnp.int32)),
        grid=(B_pad // TB,),
        in_specs=[
            pl.BlockSpec((TB, F_IN), lambda i: (i, 0)),     # states: streamed
            pl.BlockSpec((F_IN, F_HID), lambda i: (0, 0)),  # W1: VMEM-resident
            pl.BlockSpec((1, F_HID), lambda i: (0, 0)),     # b1
            pl.BlockSpec((F_HID, F_ACT), lambda i: (0, 0)), # W2
            pl.BlockSpec((1, F_ACT), lambda i: (0, 0)),     # b2
            pl.BlockSpec((TB, F_ACT), lambda i: (i, 0)),    # gumbel: streamed
        ],
        out_specs=(pl.BlockSpec((TB, F_ACT), lambda i: (i, 0)),
                   pl.BlockSpec((TB, LANE), lambda i: (i, 0))),
        compiler_params=pltpu.CompilerParams(
            dimension_semantics=("parallel",),      # megacore split on v7x
            vmem_limit_bytes=32 * 1024 * 1024),     # safe on v7x 64MiB VMEM
    )(xp, w1p, b1p, w2p, b2p, gumbel)

    return logp[:B, :ACT], act[:B, 0]


if __name__ == "__main__":
    B, OBS, HID, ACT = 8, 16, 32, 8

    key = jax.random.PRNGKey(0)
    k1, k2, k3, k_sample = jax.random.split(key, 4)

    # deterministic parameter init (synthetic, not a checkpoint)
    states = jax.random.normal(k1, (B, OBS), dtype=jnp.float32)
    w1 = jax.random.normal(k2, (OBS, HID), dtype=jnp.float32) * 0.1
    b1 = jnp.zeros((1, HID), dtype=jnp.float32)
    w2 = jax.random.normal(k3, (HID, ACT), dtype=jnp.float32) * 0.1
    b2 = jnp.zeros((1, ACT), dtype=jnp.float32)

    logp, actions = actor_categorical_forward(states, w1, b1, w2, b2, k_sample)
    jax.block_until_ready((logp, actions))

    # reference (pure JAX) with identical bf16-operand / f32-accum matmuls
    xb = states.astype(jnp.bfloat16)
    h_ref = jnp.maximum(
        jnp.dot(xb, w1.astype(jnp.bfloat16),
                preferred_element_type=jnp.float32) + b1, 0.0)
    logits_ref = jnp.dot(h_ref.astype(jnp.bfloat16), w2.astype(jnp.bfloat16),
                         preferred_element_type=jnp.float32) + b2
    logp_ref = logits_ref - jax.scipy.special.logsumexp(
        logits_ref, axis=-1, keepdims=True)

    assert logp.shape == (B, ACT)
    assert jnp.allclose(logp, logp_ref, atol=2e-2), "log-prob mismatch"
    assert actions.shape == (B,) and actions.dtype == jnp.int32
    assert bool(jnp.all((actions >= 0) & (actions < ACT)))
    # TODO(synk): sampled actions match Categorical.sample in distribution
    # (Gumbel-max on host-generated noise), not bitwise with torch's RNG stream.

    print("KERNEL_OK")
</pallas_src>

<mosaic_0001>
module attributes {stable_mosaic.version = 11 : i64} {
  func.func @_actor_categorical_kernel(%arg0: i32, %arg1: memref<8x128xbf16, #tpu.memory_space<vmem>>, %arg2: memref<128x128xbf16, #tpu.memory_space<vmem>>, %arg3: memref<1x128xf32, #tpu.memory_space<vmem>>, %arg4: memref<128x128xbf16, #tpu.memory_space<vmem>>, %arg5: memref<1x128xf32, #tpu.memory_space<vmem>>, %arg6: memref<8x128xf32, #tpu.memory_space<vmem>>, %arg7: memref<8x128xf32, #tpu.memory_space<vmem>>, %arg8: memref<8x128xi32, #tpu.memory_space<vmem>>) attributes {dimension_semantics = [#tpu.dimension_semantics<parallel>], iteration_bounds = array<i64: 1>, scalar_prefetch = 0 : i64, scratch_operands = 0 : i64, tpu.core_type = #tpu.core_type<tc>, window_params = [{transform_indices = @transform_0, window_bounds = array<i64: 8, 128>}, {pipeline_mode = #tpu.pipeline_mode<synchronous>, transform_indices = @transform_1, window_bounds = array<i64: 128, 128>}, {pipeline_mode = #tpu.pipeline_mode<synchronous>, transform_indices = @transform_2, window_bounds = array<i64: 1, 128>}, {pipeline_mode = #tpu.pipeline_mode<synchronous>, transform_indices = @transform_3, window_bounds = array<i64: 128, 128>}, {pipeline_mode = #tpu.pipeline_mode<synchronous>, transform_indices = @transform_4, window_bounds = array<i64: 1, 128>}, {transform_indices = @transform_5, window_bounds = array<i64: 8, 128>}, {transform_indices = @transform_6, window_bounds = array<i64: 8, 128>}, {transform_indices = @transform_7, window_bounds = array<i64: 8, 128>}]} {
    %c0 = arith.constant 0 : index
    %c0_0 = arith.constant 0 : index
    %0 = vector.load %arg1[%c0, %c0_0] : memref<8x128xbf16, #tpu.memory_space<vmem>>, vector<8x128xbf16>
    %c0_1 = arith.constant 0 : index
    %c0_2 = arith.constant 0 : index
    %1 = vector.load %arg2[%c0_1, %c0_2] : memref<128x128xbf16, #tpu.memory_space<vmem>>, vector<128x128xbf16>
    %cst = arith.constant dense<0.000000e+00> : vector<8x128xf32>
    %2 = tpu.matmul %0, %1, %cst {dimension_numbers = #tpu.dot_dimension_numbers<[1], [0], [0], [1], [0, 0, 1, 1], [], []>} : vector<8x128xbf16>, vector<128x128xbf16>, vector<8x128xf32> -> vector<8x128xf32>
    %c0_3 = arith.constant 0 : index
    %c0_4 = arith.constant 0 : index
    %3 = vector.load %arg3[%c0_3, %c0_4] : memref<1x128xf32, #tpu.memory_space<vmem>>, vector<1x128xf32>
    %4 = vector.broadcast %3 : vector<1x128xf32> to vector<8x128xf32>
    %5 = arith.addf %2, %4 : vector<8x128xf32>
    %cst_5 = arith.constant 0.000000e+00 : f32
    %6 = vector.broadcast %cst_5 : f32 to vector<8x128xf32>
    %7 = arith.maximumf %5, %6 : vector<8x128xf32>
    %8 = arith.truncf %7 : vector<8x128xf32> to vector<8x128xbf16>
    %c0_6 = arith.constant 0 : index
    %c0_7 = arith.constant 0 : index
    %9 = vector.load %arg4[%c0_6, %c0_7] : memref<128x128xbf16, #tpu.memory_space<vmem>>, vector<128x128xbf16>
    %cst_8 = arith.constant dense<0.000000e+00> : vector<8x128xf32>
    %10 = tpu.matmul %8, %9, %cst_8 {dimension_numbers = #tpu.dot_dimension_numbers<[1], [0], [0], [1], [0, 0, 1, 1], [], []>} : vector<8x128xbf16>, vector<128x128xbf16>, vector<8x128xf32> -> vector<8x128xf32>
    %c0_9 = arith.constant 0 : index
    %c0_10 = arith.constant 0 : index
    %11 = vector.load %arg5[%c0_9, %c0_10] : memref<1x128xf32, #tpu.memory_space<vmem>>, vector<1x128xf32>
    %12 = vector.broadcast %11 : vector<1x128xf32> to vector<8x128xf32>
    %13 = arith.addf %10, %12 : vector<8x128xf32>
    %14 = tpu.iota {dimensions = array<i32: 1>} : vector<8x128xi32>
    %c8_i32 = arith.constant 8 : i32
    %15 = vector.broadcast %c8_i32 : i32 to vector<8x128xi32>
    %16 = arith.cmpi slt, %14, %15 : vector<8x128xi32>
    %cst_11 = arith.constant -1.000000e+30 : f32
    %17 = vector.broadcast %cst_11 : f32 to vector<8x128xf32>
    %18 = arith.select %16, %13, %17 : vector<8x128xi1>, vector<8x128xf32>
    %cst_12 = arith.constant dense<0xFF800000> : vector<8xf32>
    %19 = vector.multi_reduction <maximumf>, %18, %cst_12 [1] : vector<8x128xf32> to vector<8xf32>
    %20 = vector.shape_cast %19 : vector<8xf32> to vector<8x1xf32>
    %21 = vector.broadcast %20 : vector<8x1xf32> to vector<8x128xf32>
    %22 = arith.subf %18, %21 : vector<8x128xf32>
    %23 = math.exp %22 : vector<8x128xf32>
    %cst_13 = arith.constant dense<0.000000e+00> : vector<8xf32>
    %24 = vector.multi_reduction <add>, %23, %cst_13 [1] : vector<8x128xf32> to vector<8xf32>
    %25 = vector.shape_cast %24 : vector<8xf32> to vector<8x1xf32>
    %26 = math.log %25 : vector<8x1xf32>
    %27 = arith.addf %20, %26 : vector<8x1xf32>
    %28 = vector.broadcast %27 : vector<8x1xf32> to vector<8x128xf32>
    %29 = arith.subf %18, %28 : vector<8x128xf32>
    %c0_14 = arith.constant 0 : index
    %c0_15 = arith.constant 0 : index
    %30 = vector.load %arg7[%c0_14, %c0_15] : memref<8x128xf32, #tpu.memory_space<vmem>>, vector<8x128xf32>
    tpu.vector_store %arg7[%c0_14, %c0_15], %29 {strides = array<i32>} : memref<8x128xf32, #tpu.memory_space<vmem>>, vector<8x128xf32>,
    %c0_16 = arith.constant 0 : index
    %c0_17 = arith.constant 0 : index
    %31 = vector.load %arg6[%c0_16, %c0_17] : memref<8x128xf32, #tpu.memory_space<vmem>>, vector<8x128xf32>
    %32 = arith.addf %29, %31 : vector<8x128xf32>
    %cst_18 = arith.constant -1.000000e+30 : f32
    %33 = vector.broadcast %cst_18 : f32 to vector<8x128xf32>
    %34 = arith.select %16, %32, %33 : vector<8x128xi1>, vector<8x128xf32>
    %cst_19 = arith.constant dense<0xFF800000> : vector<8xf32>
    %35 = vector.multi_reduction <maximumf>, %34, %cst_19 [1] : vector<8x128xf32> to vector<8xf32>
    %36 = vector.shape_cast %35 : vector<8xf32> to vector<8x1xf32>
    %37 = vector.broadcast %36 : vector<8x1xf32> to vector<8x128xf32>
    %38 = arith.cmpf oge, %34, %37 : vector<8x128xf32>
    %c2147483647_i32 = arith.constant 2147483647 : i32
    %39 = vector.broadcast %c2147483647_i32 : i32 to vector<8x128xi32>
    %40 = arith.select %38, %14, %39 : vector<8x128xi1>, vector<8x128xi32>
    %cst_20 = arith.constant dense<2147483647> : vector<8xi32>
    %41 = vector.multi_reduction <minsi>, %40, %cst_20 [1] : vector<8x128xi32> to vector<8xi32>
    %42 = vector.shape_cast %41 : vector<8xi32> to vector<8x1xi32>
    %43 = vector.shape_cast %42 : vector<8x1xi32> to vector<8x1xi32>
    %44 = vector.broadcast %43 : vector<8x1xi32> to vector<8x128xi32>
    %c0_21 = arith.constant 0 : index
    %c0_22 = arith.constant 0 : index
    %45 = vector.load %arg8[%c0_21, %c0_22] : memref<8x128xi32, #tpu.memory_space<vmem>>, vector<8x128xi32>
    tpu.vector_store %arg8[%c0_21, %c0_22], %44 {strides = array<i32>} : memref<8x128xi32, #tpu.memory_space<vmem>>, vector<8x128xi32>,
    return
  }
  func.func @transform_0(%arg0: i32) -> (i32, i32) {
    %c0_i32 = arith.constant 0 : i32
    %c0_i32_0 = arith.constant 0 : i32
    return %arg0, %c0_i32 : i32, i32
  }
  func.func @transform_1(%arg0: i32) -> (i32, i32) {
    %c0_i32 = arith.constant 0 : i32
    %c0_i32_0 = arith.constant 0 : i32
    %c0_i32_1 = arith.constant 0 : i32
    return %c0_i32, %c0_i32_0 : i32, i32
  }
  func.func @transform_2(%arg0: i32) -> (i32, i32) {
    %c0_i32 = arith.constant 0 : i32
    %c0_i32_0 = arith.constant 0 : i32
    %c0_i32_1 = arith.constant 0 : i32
    return %c0_i32, %c0_i32_0 : i32, i32
  }
  func.func @transform_3(%arg0: i32) -> (i32, i32) {
    %c0_i32 = arith.constant 0 : i32
    %c0_i32_0 = arith.constant 0 : i32
    %c0_i32_1 = arith.constant 0 : i32
    return %c0_i32, %c0_i32_0 : i32, i32
  }
  func.func @transform_4(%arg0: i32) -> (i32, i32) {
    %c0_i32 = arith.constant 0 : i32
    %c0_i32_0 = arith.constant 0 : i32
    %c0_i32_1 = arith.constant 0 : i32
    return %c0_i32, %c0_i32_0 : i32, i32
  }
  func.func @transform_5(%arg0: i32) -> (i32, i32) {
    %c0_i32 = arith.constant 0 : i32
    %c0_i32_0 = arith.constant 0 : i32
    return %arg0, %c0_i32 : i32, i32
  }
  func.func @transform_6(%arg0: i32) -> (i32, i32) {
    %c0_i32 = arith.constant 0 : i32
    %c0_i32_0 = arith.constant 0 : i32
    return %arg0, %c0_i32 : i32, i32
  }
  func.func @transform_7(%arg0: i32) -> (i32, i32) {
    %c0_i32 = arith.constant 0 : i32
    %c0_i32_0 = arith.constant 0 : i32
    return %arg0, %c0_i32 : i32, i32
  }
}

</mosaic_0001>

<bundles_post_ra>
// kernel: actor_categorical_forward.1
= control target key start
LH: loop header
LB: loop body
LE: loop exit
PB: predicated region body
PF: predicated region fallthrough
CT: control target
= control target key end

     0   :  { %v429_v1 = vmov 0.0   ;;  %vm430_vm0 = vmmov 0   ;;  %s540_s0 = inlined_call_operand.vmem [shape: bf16[8,128], index: 0, kind: input, shape index: {}]   ;;  %s541_s1 = inlined_call_operand.vmem [shape: bf16[128,128], index: 1, kind: input, shape index: {}]   ;;  %s542_s2 = inlined_call_operand.vmem [shape: f32[1,128], index: 2, kind: input, shape index: {}]   ;;  %s543_s3 = inlined_call_operand.vmem [shape: bf16[128,128], index: 3, kind: input, shape index: {}]   ;;  %s544_s4 = inlined_call_operand.vmem [shape: f32[1,128], index: 4, kind: input, shape index: {}]   ;;  %s545_s5 = inlined_call_operand.vmem [shape: f32[8,128], index: 5, kind: input, shape index: {}]   ;;  %s546_s6 = inlined_call_operand.hbm [shape: f32[8,128], index: 6, kind: output, shape index: {0}]   ;;  %s547_s7 = inlined_call_operand.vmem [shape: s32[8,128], index: 7, kind: output, shape index: {1}]  }
   0x1   :  { %v387_v0 = vld [vmem:[%s541_s1 + $0x38] sm:$0xff]   ;;  %344 = vmatprep.subr.bf16.mxu0 %v429_v1  ;;  %364 = vmatprep.subr.bf16.mxu1 %v429_v1  ;;  %v388_v2 = vld [vmem:[%s541_s1 + $0x30] sm:$0xff]   ;;  %v389_v3 = vld [vmem:[%s541_s1 + $0x28] sm:$0xff]  }
   0x2   :  { %345 = vmatpush3.bf16.msra.mxu0 %v387_v0  ;;  %360 = vmatprep.mubr.msk.bf16.mxu0 %vm430_vm0, %v429_v1  ;;  %v395_v4 = vld [vmem:[%s543_s3 + $0x38] sm:$0xff]   ;;  %v390_v5 = vld [vmem:[%s541_s1 + $0x20] sm:$0xff]   ;;  %v396_v6 = vld [vmem:[%s543_s3 + $0x30] sm:$0xff]  }
   0x3   :  { %346 = vmatprep.subr.bf16.mxu0 %v429_v1  ;;  %380 = vmatprep.mubr.msk.bf16.mxu1 %vm430_vm0, %v429_v1  ;;  %v391_v7 = vld [vmem:[%s541_s1 + $0x18] sm:$0xff]   ;;  %v397_v8 = vld [vmem:[%s543_s3 + $0x28] sm:$0xff]  }
   0x4   :  { %365 = vmatpush3.bf16.msra.mxu1 %v395_v4 }
   0x5   :  { %366 = vmatprep.subr.bf16.mxu1 %v429_v1 }
   0x6   :  { %347 = vmatpush3.bf16.msra.mxu0 %v388_v2 }
   0x7   :  { %348 = vmatprep.subr.bf16.mxu0 %v429_v1 }
   0x8   :  { %367 = vmatpush3.bf16.msra.mxu1 %v396_v6 }
   0x9   :  { %368 = vmatprep.subr.bf16.mxu1 %v429_v1 }
   0xa   :  { %349 = vmatpush3.bf16.msra.mxu0 %v389_v3 }
   0xb   :  { %350 = vmatprep.subr.bf16.mxu0 %v429_v1 }
   0xe   :  { %351 = vmatpush3.bf16.msra.mxu0 %v390_v5 }
   0xf   :  { %352 = vmatprep.subr.bf16.mxu0 %v429_v1 }
  0x10   :  { %13 = vsyncpa [#allocation3], 0  ;;  %v392_v9 = vld [vmem:[%s541_s1 + $0x10] sm:$0xff]   ;;  %369 = vmatpush3.bf16.msra.mxu1 %v397_v8  ;;  %v398_v10 = vld [vmem:[%s543_s3 + $0x20] sm:$0xff]   ;;  %v252_v26 = vlaneseq }
  0x11   :  { %370 = vmatprep.subr.bf16.mxu1 %v429_v1  ;;  %v393_v11 = vld [vmem:[%s541_s1 + $0x8] sm:$0xff]   ;;  %v399_v12 = vld [vmem:[%s543_s3 + $0x18] sm:$0xff]   ;;  %v394_v13 = vld [vmem:[%s541_s1] sm:$0xff]  }
  0x12   :  { %353 = vmatpush3.bf16.msra.mxu0 %v391_v7  ;;  %v400_v14 = vld [vmem:[%s543_s3 + $0x10] sm:$0xff]   ;;  %v27_v15 = vld [vmem:[%s540_s0] sm:$0xf]  ;;  %v401_v16 = vld [vmem:[%s543_s3 + $0x8] sm:$0xff]   ;;  %v253_v27 = vand.u32 127, %v252_v26 }
  0x13   :  { %354 = vmatprep.subr.bf16.mxu0 %v429_v1  ;;  %v402_v17 = vld [vmem:[%s543_s3] sm:$0xff]  }
  0x14   :  { %371 = vmatpush3.bf16.msra.mxu1 %v398_v10  ;;  %v308_v18 = vld [vmem:[%s542_s2] ss:$0 sm:$0xff]  ;;  %vm254_vm1 = vcmp.lt.s32.totalorder %v253_v27, 8 }
  0x15   :  { %372 = vmatprep.subr.bf16.mxu1 %v429_v1  ;;  %v317_v28 = vld [vmem:[%s544_s4] ss:$0 sm:$0xff]  ;;  %s431_s4 = smov [#allocation2]  }
  0x16   :  { %355 = vmatpush3.bf16.msra.mxu0 %v392_v9  ;;  %v268_v43 = vld [vmem:[%s545_s5] sm:$0xff]  ;;  %s296_s5 = sshll.u32 %s431_s4, 4  ;;  %s297_s5 = int_to_ptr.vmem [resolvable:$true] %s296_s5 }
  0x17   :  { %356 = vmatprep.subr.bf16.mxu0 %v429_v1  ;;  %s407_s14 = scalar_lea.vmem %s297_s5, 128  ;;  %p412_p1 = scmp.lt.s32.totalorder %s297_s5, %s297_s5 }
  0x18   :  { %373 = vmatpush3.bf16.msra.mxu1 %v399_v12  ;;  %p408_p0 = scmp.ne.s32.totalorder %s297_s5, %s407_s14  ;;  %p413_p2 = scmp.lt.s32.totalorder %s407_s14, %s407_s14 }
  0x19   :  { %374 = vmatprep.subr.bf16.mxu1 %v429_v1 }
  0x1a   :  { %357 = vmatpush3.bf16.msra.mxu0 %v393_v11  ;;  %p414_p3 = por %p413_p2, %p412_p1 }
  0x1b   :  { %358 = vmatprep.subr.bf16.mxu0 %v429_v1 }
  0x1c   :  { %375 = vmatpush3.bf16.msra.mxu1 %v400_v14  ;;  %p415_p4 = pnand %p414_p3, %p408_p0 }
  0x1d   :  { %376 = vmatprep.subr.bf16.mxu1 %v429_v1 }
  0x1e   :  { %359 = vmatpush3.bf16.msra.mxu0 %v394_v13 }
  0x20   :  { %377 = vmatpush3.bf16.msra.mxu1 %v401_v16 }
  0x21   :  { %361 = vmatmul.mubr.bf16.vlgmr.msra.gmra.mxu0 %v27_v15  ;;  %378 = vmatprep.subr.bf16.mxu1 %v429_v1 }
  0x24   :  { %379 = vmatpush3.bf16.msra.mxu1 %v402_v17 }
  0xe1   :  { %v133_v19 = vpop.f32.mrf.mxu0 }
  0xe2   :  { %v134_v20 = vadd.f32 %v308_v18, %v133_v19 }
  0xe3   :  { %v362_v21 = vpop.f32.mrf.mxu0 }
  0xe4   :  { %v139_v22 = vmax.f32 %v134_v20, 0.0 }
  0xe5   :  { %v136_v23 = vpop.f32.mrf.mxu0 }
  0xe6   :  { %v140_v24 = vpack.c.bf16 %v139_v22, %v139_v22 }
  0xe7   :  { %v363_v25 = vpop.f32.mrf.mxu0 }
  0xe8   :  { %381 = vmatmul.mubr.bf16.vlgmr.msra.gmra.mxu1 %v140_v24 }
 0x1a8   :  { %v246_v29 = vpop.f32.mrf.mxu1 }
 0x1a9   :  { %v247_v30 = vadd.f32 %v317_v28, %v246_v29 }
 0x1aa   :  { %v382_v31 = vpop.f32.mrf.mxu1 }
 0x1ab   :  { %v255_v32 = vsel %vm254_vm1, %v247_v30, -1e+30 }
 0x1ac   :  { %256 = vmax.xlane.f32.xlu0 %v255_v32  ;;  %v249_v33 = vpop.f32.mrf.mxu1 }
 0x1ae   :  { %v383_v34 = vpop.f32.mrf.mxu1 }
 0x235   :  { %v257_v35 = vpop.xlane.xlu0 %256 }
 0x236   :  { %v258_v36 = vsub.f32 %v255_v32, %v257_v35 }
 0x238   :  { %v259_v37 = vmul.f32 1.442695, %v258_v36 }
 0x23a   :  { %403 = vpow2.f32 %v259_v37 }
 0x247   :  { %v404_v38 = vpop.eup %403 }
 0x248   :  { %261 = vadd.xlane.f32.xlu0 %v404_v38 }
 0x2d1   :  { %v262_v39 = vpop.xlane.xlu0 %261 }
 0x2d2   :  { %405 = vlog2.f32 %v262_v39 }
 0x2df   :  { %v406_v40 = vpop.eup %405 }
 0x2e0   :  { %v264_v41 = vmul.f32 0.6931472, %v406_v40 }
 0x2e2   :  { %v265_v42 = vadd.f32 %v264_v41, %v257_v35 }
 0x2e4   :  { %v266_v44 = vsub.f32 %v255_v32, %v265_v42 }
 0x2e6   :  { %v269_v45 = vadd.f32 %v268_v43, %v266_v44  ;;  %267 = vst [vmem:[#allocation2] sm:$0xff] %v266_v44 }
 0x2e8   :  { %v270_v46 = vsel %vm254_vm1, %v269_v45, -1e+30 }
 0x2e9   :  { %271 = vmax.xlane.f32.xlu1 %v270_v46 }
 0x372   :  { %v272_v47 = vpop.xlane.xlu1 %271 }
 0x373   :  { %vm273_vm2 = vcmp.ge.f32.partialorder %v270_v46, %v272_v47 }
 0x374   :  { %v274_v48 = vsel %vm273_vm2, %v253_v27, 2147483647 }
 0x375   :  { %v276_v49 = vshra.s32 %v274_v48, 16  ;;  %v275_v51 = vand.u32 65535, %v274_v48 }
 0x377   :  { %v278_v50 = vcvt.s32.f32 %v276_v49  ;;  %v277_v53 = vcvt.s32.f32 %v275_v51 }
 0x379   :  { %279 = vmin.xlane.f32.xlu1 %v278_v50 }
 0x402   :  { %v280_v52 = vpop.xlane.xlu1 %279 }
 0x403   :  { %vm281_vm3 = vcmp.eq.f32.partialorder %v278_v50, %v280_v52 }
 0x404   :  { %v282_v54 = vsel %vm281_vm3, %v277_v53, inf }
 0x405   :  { %283 = vmin.xlane.f32.xlu0 %v282_v54 }
 0x406   :  { %418 = shalt.err (!%p415_p4)
}
 0x407   :  { %299 = dma.vmem_to_hbm [thread:$0]  %s297_s5, 128, %s546_s6, [#allocation3]   ;;  %v286_v55 = vcvt.f32.s32 %v280_v52 }
 0x409   :  { %v287_v57 = vshll.u32 %v286_v55, 16 }
 0x48e   :  { %v284_v56 = vpop.xlane.xlu0 %283 }
 0x48f   :  { %v285_v58 = vcvt.f32.s32 %v284_v56 }
 0x491   :  { %v288_v59 = vadd.s32 %v287_v57, %v285_v58 }
 0x493   :  { %289 = vst [vmem:[%s547_s7] sm:$0xff] %v288_v59 }
 0x494   :  { %427 = dma.done.wait [#allocation3], 128  }
 0x495   :  { %428 = vsyncadd [#allocation3], 4294967168 }
 0x496   :  { %307 = vsyncpa [#allocation3], 1 }

</bundles_post_ra>
